<compile_context>
chip_gen: v7x
topology: tpu7x:2x2x1
jax: 0.10.0
libtpu: 0.0.40
codegen_flags: <defaults>
</compile_context>

<pallas_src>
import functools

import jax
import jax.numpy as jnp
from jax import lax
from jax.experimental import pallas as pl
from jax.experimental.pallas import tpu as pltpu


def _round_up(x: int, m: int) -> int:
    return ((x + m - 1) // m) * m


def _ce_kernel(n_valid, tn, steps, n_full_blocks,
               logits_ref, tgt_ref, out_ref, acc_ref):
    """Cross-entropy over a (C, tn) logits tile (batch on the 128-lane axis).

    logits_ref: (C, tn) input dtype (f32/bf16), tgt_ref: (1, tn) int32,
    out_ref: (1, 8, 128) f32 per-split partial-sum block,
    acc_ref: (1, tn) f32 VMEM scratch (per-lane loss accumulator).
    """
    split = pl.program_id(0)          # parallel (megacore) axis
    step = pl.program_id(1)           # carried-accumulator axis

    @pl.when(step == 0)
    def _():
        acc_ref[...] = jnp.zeros_like(acc_ref)

    logits = logits_ref[...].astype(jnp.float32)              # (C, tn)
    tgt = tgt_ref[...].astype(jnp.int32)                      # (1, tn)

    # Numerically stable log-sum-exp over the class (sublane) axis.
    m = jnp.max(logits, axis=0, keepdims=True)                # (1, tn)
    lse = m + jnp.log(jnp.sum(jnp.exp(logits - m), axis=0, keepdims=True))

    # Gather the target-class logit via a sublane-iota one-hot (VPU + XLU).
    cls = lax.broadcasted_iota(jnp.int32, logits.shape, 0)    # (C, tn)
    picked = jnp.sum(jnp.where(cls == tgt, logits, 0.0), axis=0, keepdims=True)

    contrib = lse - picked                                    # (1, tn)
    gi = split * steps + step                                 # global column-block index

    # Steady-state blocks are fully in-range: accumulate unmasked.
    @pl.when(gi < n_full_blocks)
    def _():
        acc_ref[...] += contrib

    # Ragged last block (and any clamped overshoot block): mask columns >= N.
    # Garbage (possibly non-finite) lanes from the partial DMA stay lane-local
    # and are selected away before touching the accumulator.
    @pl.when(gi >= n_full_blocks)
    def _():
        col = gi * tn + lax.broadcasted_iota(jnp.int32, (1, tn), 1)
        acc_ref[...] += jnp.where(col < n_valid, contrib, 0.0)

    # Per-split finalize: one cross-lane reduce, broadcast into this split's
    # output block.  The wrapper adds the partials and divides by N.
    @pl.when(step == pl.num_programs(1) - 1)
    def _():
        out_ref[...] = jnp.broadcast_to(jnp.sum(acc_ref[...]), out_ref.shape)


def _cross_entropy_pallas_cn(logits_cn, targets, *,
                             tile_n_max: int = 32768, num_splits: int = 2):
    """Mean cross-entropy from class-major logits.

    logits_cn: (C, N) float (f32 or bf16) -- class-major, so no HBM transpose.
    targets:   (N,) int class indices.
    """
    C, N = logits_cn.shape
    assert targets.shape == (N,)

    tile_n_max = max(128, _round_up(tile_n_max, 128))

    # Adaptive tile: balance per-step payload vs. grid overhead, keep the last
    # block's masked slack under 128 columns, and keep the column-block count
    # splittable across `num_splits` parallel (megacore) shards.
    nblocks = max(num_splits, pl.cdiv(N, tile_n_max))
    nblocks = _round_up(nblocks, num_splits)
    tn = min(tile_n_max, _round_up(pl.cdiv(N, nblocks), 128))
    total_blocks = pl.cdiv(N, tn)            # column blocks that contain data
    steps = pl.cdiv(total_blocks, num_splits)
    n_full_blocks = N // tn                  # blocks with no out-of-range columns
    last_block = total_blocks - 1

    tgt = targets.reshape(1, N)              # free reshape; streamed as-is

    def col_block(s, i):
        # Clamp so a (rare) fully-out-of-range logical block re-reads the last
        # valid block; its columns are masked out of the accumulation anyway.
        return jnp.minimum(s * steps + i, last_block)

    kernel = functools.partial(_ce_kernel, N, tn, steps, n_full_blocks)

    partial_sums = pl.pallas_call(
        kernel,
        out_shape=jax.ShapeDtypeStruct((num_splits, 8, 128), jnp.float32),
        grid=(num_splits, steps),
        in_specs=[
            pl.BlockSpec((C, tn), lambda s, i: (0, col_block(s, i))),
            pl.BlockSpec((1, tn), lambda s, i: (0, col_block(s, i))),
        ],
        out_specs=pl.BlockSpec((1, 8, 128), lambda s, i: (s, 0, 0)),
        scratch_shapes=[pltpu.VMEM((1, tn), jnp.float32)],
        compiler_params=pltpu.CompilerParams(
            dimension_semantics=("parallel", "arbitrary")),
    )(logits_cn, tgt)

    return jnp.sum(partial_sums[:, 0, 0]) * (1.0 / float(N))


def _ce_mean_xla(logits_nc, targets):
    """Plain-XLA mean cross-entropy (fast path for tiny problems)."""
    logp = jax.nn.log_softmax(logits_nc.astype(jnp.float32), axis=-1)
    nll = -jnp.take_along_axis(logp, targets.astype(jnp.int32)[:, None], axis=-1)
    return jnp.mean(nll)


def cross_entropy_mean(logits, targets, *, class_major: bool = False,
                       tile_n_max: int = 32768):
    """Mean cross-entropy (PyTorch nn.CrossEntropyLoss default reduction).

    If class_major, logits are (C, N) (preferred: no transpose copy);
    otherwise logits are (N, C) (PyTorch convention) and a last-resort
    transpose is applied before the kernel.
    """
    if class_major:
        C, N = logits.shape
    else:
        N, C = logits.shape

    # Tiny problem: kernel-invocation overhead dominates actual work; a pure
    # XLA path is strictly faster and avoids any layout copies.
    if N * C < 16384:
        logits_nc = logits.T if class_major else logits
        return _ce_mean_xla(logits_nc, targets)

    if class_major:
        logits_cn = logits
    else:
        # TODO(synk): last-resort transpose (extra HBM pass); prefer emitting
        # class-major logits from the classifier head upstream.
        logits_cn = logits.T
    return _cross_entropy_pallas_cn(logits_cn, targets, tile_n_max=tile_n_max)


def mtl_retinal_selector_loss(preds, cac, dr, *, class_major: bool = False):
    """Mirror of MTLRetinalSelectorLoss.forward.

    preds: tuple (cac_logits_or_None, dr_logits_or_None)
    cac:   int targets for the CAC head
    dr:    int targets for the DR head
    """
    selector = 0 if preds[1] is None else 1
    if selector == 0:
        assert preds[0] is not None
        return cross_entropy_mean(preds[0], cac, class_major=class_major)
    else:
        assert preds[1] is not None
        return cross_entropy_mean(preds[1], dr, class_major=class_major)


if __name__ == "__main__":
    key = jax.random.PRNGKey(0)
    k1, k2, k3, k4, k5, k6 = jax.random.split(key, 6)

    # Small shapes matching the module's two classification heads.
    N = 8
    C_CAC, C_DR = 4, 5

    cac_logits = jax.random.normal(k1, (N, C_CAC), dtype=jnp.float32)
    dr_logits = jax.random.normal(k2, (N, C_DR), dtype=jnp.float32)
    cac_targets = jax.random.randint(k3, (N,), 0, C_CAC, dtype=jnp.int32)
    dr_targets = jax.random.randint(k4, (N,), 0, C_DR, dtype=jnp.int32)

    # Branch 0 (dr pred is None) and branch 1 of the selector (tiny-N fast path).
    loss_cac = mtl_retinal_selector_loss((cac_logits, None), cac_targets, dr_targets)
    loss_dr = mtl_retinal_selector_loss((cac_logits, dr_logits), cac_targets, dr_targets)

    # Pallas path: class-major bf16 logits (as a class-major classifier head
    # would emit), ragged last block, multi-step grid, 2-way parallel split.
    N_BIG = 4500
    big_logits_cn = jax.random.normal(k5, (C_DR, N_BIG), dtype=jnp.bfloat16)
    big_targets = jax.random.randint(k6, (N_BIG,), 0, C_DR, dtype=jnp.int32)

    # Small tile -> grid (2, 5) with a partial + a clamped overshoot block.
    loss_big_small_tile = _cross_entropy_pallas_cn(
        big_logits_cn, big_targets, tile_n_max=512)
    # Default tile -> grid (2, 1), balanced halves.
    loss_big_default = _cross_entropy_pallas_cn(big_logits_cn, big_targets)
    # Same data via the public selector (DR branch, class-major, Pallas path).
    loss_big_selector = mtl_retinal_selector_loss(
        (None, big_logits_cn), cac_targets, big_targets, class_major=True)

    jax.block_until_ready((loss_cac, loss_dr, loss_big_small_tile,
                           loss_big_default, loss_big_selector))

    # Reference (pure JAX, written independently of the fast path).
    def ref_ce(logits_nc, tgt):
        x = logits_nc.astype(jnp.float32)
        lse = jax.nn.logsumexp(x, axis=-1)
        picked = x[jnp.arange(x.shape[0]), tgt.astype(jnp.int32)]
        return jnp.mean(lse - picked)

    assert jnp.allclose(loss_cac, ref_ce(cac_logits, cac_targets), atol=1e-5)
    assert jnp.allclose(loss_dr, ref_ce(dr_logits, dr_targets), atol=1e-5)

    ref_big = ref_ce(big_logits_cn.T, big_targets)
    assert jnp.allclose(loss_big_small_tile, ref_big, atol=1e-4, rtol=1e-4)
    assert jnp.allclose(loss_big_default, ref_big, atol=1e-4, rtol=1e-4)
    assert jnp.allclose(loss_big_selector, ref_big, atol=1e-4, rtol=1e-4)

    print("KERNEL_OK")
</pallas_src>

<mosaic_0001>
module attributes {stable_mosaic.version = 11 : i64} {
  func.func @_ce_kernel(%arg0: i32, %arg1: i32, %arg2: memref<5x512xbf16, #tpu.memory_space<vmem>>, %arg3: memref<1x512xi32, #tpu.memory_space<vmem>>, %arg4: memref<1x8x128xf32, #tpu.memory_space<vmem>>, %arg5: memref<1x512xf32, #tpu.memory_space<vmem>>) attributes {dimension_semantics = [#tpu.dimension_semantics<parallel>, #tpu.dimension_semantics<arbitrary>], iteration_bounds = array<i64: 2, 5>, scalar_prefetch = 0 : i64, scratch_operands = 1 : i64, tpu.core_type = #tpu.core_type<tc>, window_params = [{transform_indices = @transform_0, window_bounds = array<i64: 5, 512>}, {transform_indices = @transform_1, window_bounds = array<i64: 1, 512>}, {transform_indices = @transform_2, window_bounds = array<i64: 1, 8, 128>}]} {
    %c0_i32 = arith.constant 0 : i32
    %0 = arith.cmpi eq, %arg1, %c0_i32 : i32
    %1 = arith.extui %0 : i1 to i32
    %c0_i32_0 = arith.constant 0 : i32
    %2 = arith.cmpi ne, %1, %c0_i32_0 : i32
    scf.if %2 {
      %cst_11 = arith.constant 0.000000e+00 : f32
      %34 = vector.broadcast %cst_11 : f32 to vector<1x512xf32>
      %c0_12 = arith.constant 0 : index
      %c0_13 = arith.constant 0 : index
      %35 = vector.load %arg5[%c0_12, %c0_13] : memref<1x512xf32, #tpu.memory_space<vmem>>, vector<1x512xf32>
      tpu.vector_store %arg5[%c0_12, %c0_13], %34 {strides = array<i32>} : memref<1x512xf32, #tpu.memory_space<vmem>>, vector<1x512xf32>,
    } else {
    }
    %c0 = arith.constant 0 : index
    %c0_1 = arith.constant 0 : index
    %3 = vector.load %arg2[%c0, %c0_1] : memref<5x512xbf16, #tpu.memory_space<vmem>>, vector<5x512xbf16>
    %4 = arith.extf %3 : vector<5x512xbf16> to vector<5x512xf32>
    %c0_2 = arith.constant 0 : index
    %c0_3 = arith.constant 0 : index
    %5 = vector.load %arg3[%c0_2, %c0_3] : memref<1x512xi32, #tpu.memory_space<vmem>>, vector<1x512xi32>
    %cst = arith.constant dense<0xFF800000> : vector<512xf32>
    %6 = vector.multi_reduction <maximumf>, %4, %cst [0] : vector<5x512xf32> to vector<512xf32>
    %7 = vector.shape_cast %6 : vector<512xf32> to vector<1x512xf32>
    %8 = vector.broadcast %7 : vector<1x512xf32> to vector<5x512xf32>
    %9 = arith.subf %4, %8 : vector<5x512xf32>
    %10 = math.exp %9 : vector<5x512xf32>
    %cst_4 = arith.constant dense<0.000000e+00> : vector<512xf32>
    %11 = vector.multi_reduction <add>, %10, %cst_4 [0] : vector<5x512xf32> to vector<512xf32>
    %12 = vector.shape_cast %11 : vector<512xf32> to vector<1x512xf32>
    %13 = math.log %12 : vector<1x512xf32>
    %14 = arith.addf %7, %13 : vector<1x512xf32>
    %15 = tpu.iota {dimensions = array<i32: 0>} : vector<5x512xi32>
    %16 = vector.broadcast %5 : vector<1x512xi32> to vector<5x512xi32>
    %17 = arith.cmpi eq, %15, %16 : vector<5x512xi32>
    %cst_5 = arith.constant 0.000000e+00 : f32
    %18 = vector.broadcast %cst_5 : f32 to vector<5x512xf32>
    %19 = arith.select %17, %4, %18 : vector<5x512xi1>, vector<5x512xf32>
    %cst_6 = arith.constant dense<0.000000e+00> : vector<512xf32>
    %20 = vector.multi_reduction <add>, %19, %cst_6 [0] : vector<5x512xf32> to vector<512xf32>
    %21 = vector.shape_cast %20 : vector<512xf32> to vector<1x512xf32>
    %22 = arith.subf %14, %21 : vector<1x512xf32>
    %c5_i32 = arith.constant 5 : i32
    %23 = arith.muli %arg0, %c5_i32 : i32
    %24 = arith.addi %23, %arg1 : i32
    %c8_i32 = arith.constant 8 : i32
    %25 = arith.cmpi slt, %24, %c8_i32 : i32
    %26 = arith.extui %25 : i1 to i32
    %c0_i32_7 = arith.constant 0 : i32
    %27 = arith.cmpi ne, %26, %c0_i32_7 : i32
    scf.if %27 {
      %c0_11 = arith.constant 0 : index
      %c0_12 = arith.constant 0 : index
      %34 = vector.load %arg5[%c0_11, %c0_12] : memref<1x512xf32, #tpu.memory_space<vmem>>, vector<1x512xf32>
      %35 = arith.addf %34, %22 : vector<1x512xf32>
      %c0_13 = arith.constant 0 : index
      %c0_14 = arith.constant 0 : index
      %36 = vector.load %arg5[%c0_13, %c0_14] : memref<1x512xf32, #tpu.memory_space<vmem>>, vector<1x512xf32>
      tpu.vector_store %arg5[%c0_13, %c0_14], %35 {strides = array<i32>} : memref<1x512xf32, #tpu.memory_space<vmem>>, vector<1x512xf32>,
    } else {
    }
    %c8_i32_8 = arith.constant 8 : i32
    %28 = arith.cmpi sge, %24, %c8_i32_8 : i32
    %29 = arith.extui %28 : i1 to i32
    %c0_i32_9 = arith.constant 0 : i32
    %30 = arith.cmpi ne, %29, %c0_i32_9 : i32
    scf.if %30 {
      %c512_i32 = arith.constant 512 : i32
      %34 = arith.muli %24, %c512_i32 : i32
      %35 = tpu.iota {dimensions = array<i32: 1>} : vector<1x512xi32>
      %36 = vector.broadcast %34 : i32 to vector<1x512xi32>
      %37 = arith.addi %36, %35 : vector<1x512xi32>
      %c0_11 = arith.constant 0 : index
      %c0_12 = arith.constant 0 : index
      %38 = vector.load %arg5[%c0_11, %c0_12] : memref<1x512xf32, #tpu.memory_space<vmem>>, vector<1x512xf32>
      %c4500_i32 = arith.constant 4500 : i32
      %39 = vector.broadcast %c4500_i32 : i32 to vector<1x512xi32>
      %40 = arith.cmpi slt, %37, %39 : vector<1x512xi32>
      %cst_13 = arith.constant 0.000000e+00 : f32
      %41 = vector.broadcast %cst_13 : f32 to vector<1x512xf32>
      %42 = arith.select %40, %22, %41 : vector<1x512xi1>, vector<1x512xf32>
      %43 = arith.addf %38, %42 : vector<1x512xf32>
      %c0_14 = arith.constant 0 : index
      %c0_15 = arith.constant 0 : index
      %44 = vector.load %arg5[%c0_14, %c0_15] : memref<1x512xf32, #tpu.memory_space<vmem>>, vector<1x512xf32>
      tpu.vector_store %arg5[%c0_14, %c0_15], %43 {strides = array<i32>} : memref<1x512xf32, #tpu.memory_space<vmem>>, vector<1x512xf32>,
    } else {
    }
    %c4_i32 = arith.constant 4 : i32
    %31 = arith.cmpi eq, %arg1, %c4_i32 : i32
    %32 = arith.extui %31 : i1 to i32
    %c0_i32_10 = arith.constant 0 : i32
    %33 = arith.cmpi ne, %32, %c0_i32_10 : i32
    scf.if %33 {
      %c0_11 = arith.constant 0 : index
      %c0_12 = arith.constant 0 : index
      %34 = vector.load %arg5[%c0_11, %c0_12] : memref<1x512xf32, #tpu.memory_space<vmem>>, vector<1x512xf32>
      %35 = vector.shape_cast %34 : vector<1x512xf32> to vector<1x1x512xf32>
      %cst_13 = arith.constant dense<0.000000e+00> : vector<1xf32>
      %36 = vector.multi_reduction <add>, %35, %cst_13 [1, 2] : vector<1x1x512xf32> to vector<1xf32>
      %37 = vector.shape_cast %36 : vector<1xf32> to vector<1x1x1xf32>
      %38 = vector.extract %37[0, 0, 0] : f32 from vector<1x1x1xf32>
      %39 = vector.broadcast %38 : f32 to vector<1x8x128xf32>
      %c0_14 = arith.constant 0 : index
      %c0_15 = arith.constant 0 : index
      %c0_16 = arith.constant 0 : index
      %40 = vector.load %arg4[%c0_14, %c0_15, %c0_16] : memref<1x8x128xf32, #tpu.memory_space<vmem>>, vector<1x8x128xf32>
      tpu.vector_store %arg4[%c0_14, %c0_15, %c0_16], %39 {strides = array<i32>} : memref<1x8x128xf32, #tpu.memory_space<vmem>>, vector<1x8x128xf32>,
    } else {
    }
    return
  }
  func.func @transform_0(%arg0: i32, %arg1: i32) -> (i32, i32) {
    %c5_i32 = arith.constant 5 : i32
    %0 = arith.muli %arg0, %c5_i32 : i32
    %1 = arith.addi %0, %arg1 : i32
    %c8_i32 = arith.constant 8 : i32
    %2 = arith.minsi %1, %c8_i32 : i32
    %c0_i32 = arith.constant 0 : i32
    %c0_i32_0 = arith.constant 0 : i32
    return %c0_i32, %2 : i32, i32
  }
  func.func @transform_1(%arg0: i32, %arg1: i32) -> (i32, i32) {
    %c5_i32 = arith.constant 5 : i32
    %0 = arith.muli %arg0, %c5_i32 : i32
    %1 = arith.addi %0, %arg1 : i32
    %c8_i32 = arith.constant 8 : i32
    %2 = arith.minsi %1, %c8_i32 : i32
    %c0_i32 = arith.constant 0 : i32
    %c0_i32_0 = arith.constant 0 : i32
    return %c0_i32, %2 : i32, i32
  }
  func.func @transform_2(%arg0: i32, %arg1: i32) -> (i32, i32, i32) {
    %c0_i32 = arith.constant 0 : i32
    %c0_i32_0 = arith.constant 0 : i32
    %c0_i32_1 = arith.constant 0 : i32
    return %arg0, %c0_i32, %c0_i32_0 : i32, i32, i32
  }
}

</mosaic_0001>

<bundles_post_ra>
// kernel: tpu_custom_call.1
= control target key start
LH: loop header
LB: loop body
LE: loop exit
PB: predicated region body
PF: predicated region fallthrough
CT: control target
= control target key end

     0   :  { %s1387_s0 = inlined_call_operand.hbm [shape: bf16[5,4500], index: 0, kind: input, shape index: {}]   ;;  %s1388_s1 = inlined_call_operand.hbm [shape: s32[1,4500], index: 1, kind: input, shape index: {}]   ;;  %s1389_s2 = inlined_call_operand.hbm [shape: f32[2,8,128], index: 2, kind: output, shape index: {}]  }
   0x1   :  { %1394 = sst [smem:[#allocation14_spill]] %s1387_s0 }
   0x2   :  { %7 = vsyncpa [#allocation4], 0 }
   0x3   :  { %9 = vsyncpa [#allocation4 + $0x1], 0 }
   0x4   :  { %10 = vsyncpa [#allocation7], 0 }
   0x5   :  { %12 = vsyncpa [#allocation7 + $0x1], 0 }
   0x6   :  { %13 = vsyncpa [#allocation5], 0 }
   0x7   :  { %15 = vsyncpa [#allocation5 + $0x1], 0  ;;  %s1025_s9 = smov 0   ;;  %s1027_s10 = smov 0  }
   0x8   :  { %s1029_s11 = smov 0   ;;  %s1031_s12 = smov 0  }
   0x9   :  { %s1033_s13 = smov 0   ;;  %s1035_s14 = smov 0  }
   0xa   :  { %s1037_s15 = smov 0   ;;  %s1039_s16 = smov 0  }
   0xb   :  { %s1041_s17 = smov 0   ;;  %s1043_s18 = smov 0  }
   0xc   :  { %s1045_s19 = smov 0  }
   0xd LB: > { %s663_s20 = sadd.s32 4294967295, %s1002_s19   ;;  %s664_s21 = sadd.s32 4294967294, %s1002_s19   ;;  %s1002_s19 = sphi %s1045_s19, %s21_s19   ;;  %s998_s18 = sphi %s1043_s18, %s1421_s18   ;;  %s994_s17 = sphi %s1041_s17, %s1420_s17   ;;  %s990_s16 = sphi %s1039_s16, %s1419_s16   ;;  %s986_s15 = sphi %s1037_s15, %s1418_s15   ;;  %s982_s14 = sphi %s1035_s14, %s1417_s14   ;;  %s978_s13 = sphi %s1033_s13, %s1416_s13   ;;  %s974_s12 = sphi %s1031_s12, %s1415_s12   ;;  %s970_s11 = sphi %s1029_s11, %s1414_s11   ;;  %s966_s10 = sphi %s1027_s10, %s1413_s10   ;;  %s962_s9 = sphi %s1025_s9, %s1412_s9  }
   0xe   : > { %s30_s22 = sadd.s32 1, %s994_s17  ;;  %s33_s23 = sadd.s32 1, %s998_s18 }
   0xf   : > { %p31_p0 = scmp.ge.s32.totalorder %s30_s22, 5  ;;  %s37_s24 = smul.u32 5, %s998_s18 }
  0x10   : > { %s48_s25 = sadd.s32 1, %s982_s14  ;;  %p55_p1 = scmp.ne.s32.totalorder %s982_s14, %s978_s13 }
  0x11   : > { %s1423_s22 = smov (%p31_p0, %s30_s22), 0  ;;  %s1425_s23 = smov (!%p31_p0, %s33_s23), %s998_s18 }
  0x12   : > { %1395 = sst [smem:[#allocation12_spill]] %s1423_s22  ;;  %s38_s26 = sadd.s32 %s994_s17, %s37_s24 }
  0x13   : > { %p56_p2 = scmp.eq.s32.totalorder %s1002_s19, 0  ;;  %p35_p3 = scmp.ge.s32.totalorder %s1425_s23, 2 }
  0x14   : > { %p39_p4 = scmp.lt.s32.totalorder %s38_s26, 8  ;;  %p61_p6 = scmp.ne.s32.totalorder %s978_s13, %s974_s12 }
  0x15   : > { %p1093_p5 = por %p56_p2, %p55_p1  ;;  %s1427_s23 = smov (%p35_p3, %s1425_s23), 0 }
  0x16   : > { %1397 = sst [smem:[#allocation13_spill]] %s1427_s23  ;;  %s1429_s26 = smov (!%p39_p4, %s38_s26), 8 }
  0x17   : > { %s41_s28 = smul.u32 5, %s1427_s23  ;;  %p62_p7 = scmp.eq.s32.totalorder %s663_s20, 0 }
  0x18   : > { %s105_s29 = ssub.s32 %s998_s18, %s1427_s23  ;;  %s108_s30 = sadd.s32 1, %s970_s11 }
  0x19   : > { %s42_s3 = sadd.s32 %s41_s28, %s1423_s22  ;;  %p1108_p8 = por %p62_p7, %p61_p6 }
  0x1a   : > { %p43_p9 = scmp.lt.s32.totalorder %s42_s3, 8  ;;  %p106_p10 = scmp.eq.s32.totalorder %s105_s29, 0 }
  0x1b   : > { %s1398_s4 = scalar_select %p1108_p8, 1, 0 }
  0x1c   : > { %p118_p11 = scmp.ne.s32.totalorder %s970_s11, %s966_s10  ;;  %p119_p12 = scmp.eq.s32.totalorder %s663_s20, 9 }
  0x1d   : > { %s1431_s3 = smov (!%p43_p9, %s42_s3), 8  ;;  %p124_p1 = scmp.ne.s32.totalorder %s966_s10, %s962_s9 }
  0x1e   : > { %s1115_s5 = scalar_select %p106_p10, %s970_s11, %s108_s30  }
  0x1f   : > { %s45_s6 = ssub.s32 %s1429_s26, %s1431_s3  ;;  %p1118_p13 = por %p119_p12, %p118_p11 }
  0x20   : > { %p46_p0 = scmp.eq.s32.totalorder %s45_s6, 0  ;;  %p125_p2 = scmp.eq.s32.totalorder %s664_s21, 9 }
  0x21   : > { %s1399_s7 = scalar_select %p1118_p13, 1, 0 }
  0x22   : > { %s1129_s8 = scalar_select %p46_p0, %s982_s14, %s48_s25  }
  0x23   : > { %p1131_p3 = por %p125_p2, %p124_p1  ;;  %p707_p4 = scmp.lt.s32.totalorder %s1002_s19, 10 }
  0x24   : > { %s1137_s20 = sand.u32 1, %s982_s14   ;;  %s686_s24 = sshll.u32 %s1429_s26, 8 }
  0x25   : > { %s1400_s12 = scalar_select %p1131_p3, 1, 0 }
  0x26   : > { %s667_s28 = sshll.u32 %s1137_s20, 4  ;;  %s1401_s0 = sld [smem:[#allocation14_spill]] }
  0x27   : > { %s149_s21 = scalar_lea.vmem [#allocation3], %s667_s28  ;;  %p1148_p6 = pnand %p707_p4, %p1093_p5 }
  0x28   : > { %s161_s25 = sshll.u32 %s149_s21, 4  ;;  %s146_s29 = scalar_lea.sflag [#allocation4], %s1137_s20  ;;  %s1152_s25 = int_to_ptr.vmem [resolvable:$true] %s161_s25 }
  0x29   : > { %p818_p11 = pneg %p1148_p6 }
  0x2c   : > { %s1144_s3 = scalar_lea.hbm %s1401_s0, %s686_s24  ;;  %s821_s30 = scalar_lea.hbm %s1401_s0, 2304 }
  0x2d   : > { %s816_s24 = scalar_lea.hbm %s1144_s3, 256  ;;  %p822_p5 = scmp.lt.u32.totalorder %s1144_s3, %s1401_s0 }
  0x2e   : > { %p817_p10 = scmp.ne.s32.totalorder %s1144_s3, %s816_s24  ;;  %p823_p1 = scmp.lt.u32.totalorder %s821_s30, %s816_s24 }
  0x2f   : > { %p825_p4 = scmp.lt.u32.totalorder %s816_s24, %s1144_s3 }
  0x30   : > { %p819_p12 = pnand %p818_p11, %p817_p10  ;;  %p824_p2 = por %p823_p1, %p822_p5 }
  0x32   : > { %p820_p0 = pneg %p819_p12  ;;  %p826_p7 = por %p825_p4, %p824_p2 }
  0x34   : > { %p827_p9 = pnand %p826_p7, %p820_p0 }
  0x36   : > { %830 = shalt.err (!%p827_p9)
}
  0x37   : > { %s831_s22 = scalar_lea.vmem %s1152_s25, 256  ;;  %s1004_s27 = smov [#allocation3]  }
  0x38   : > { %p832_p10 = scmp.ne.s32.totalorder %s1152_s25, %s831_s22  ;;  %s836_s28 = sshll.u32 %s1004_s27, 4  ;;  %s837_s28 = int_to_ptr.vmem [resolvable:$false] %s836_s28 }
  0x39   : > { %s838_s23 = scalar_lea.vmem %s837_s28, 512  ;;  %p839_p13 = scmp.lt.s32.totalorder %s1152_s25, %s837_s28 }
  0x3a   : > { %p834_p12 = pnand %p832_p10, %p818_p11  ;;  %p840_p5 = scmp.lt.s32.totalorder %s838_s23, %s831_s22 }
  0x3c   : > { %p835_p3 = pneg %p834_p12  ;;  %p841_p1 = por %p840_p5, %p839_p13 }
  0x3e   : > { %p842_p2 = pnand %p841_p1, %p835_p3 }
  0x40   : > { %845 = shalt.err (!%p842_p2)
}
  0x41   : > { %699 = dma.hbm_to_vmem [thread:$0]  (!%p1148_p6), %s1144_s3, 256, %s1152_s25, %s146_s29  }
  0x42   : > { %p1403_p7 = scmp.lt.s32.totalorder %s1002_s19, 11  ;;  %p1404_p9 = scmp.ge.s32.totalorder %s1002_s19, 1 }
  0x43   : > { %s670_s22 = sshll.u32 %s1137_s20, 2  ;;  %s687_s30 = sshll.u32 %s1429_s26, 6 }
  0x44   : > { %p1186_p0 = pnand %p1404_p9, %p1403_p7  ;;  %s1195_s28 = scalar_lea.hbm %s1388_s1, %s687_s30 }
  0x45   : > { %s172_s23 = scalar_lea.vmem [#allocation6], %s670_s22  ;;  %s169_s3 = scalar_lea.sflag [#allocation7], %s1137_s20 }
  0x46   : > { %s1405_s24 = scalar_select %p1186_p0, 1, 0 }
  0x47   : > { %s184_s0 = sshll.u32 %s172_s23, 4  ;;  %s846_s25 = scalar_lea.hbm %s1195_s28, 64  ;;  %s185_s0 = int_to_ptr.vmem [resolvable:$true] %s184_s0 }
  0x48   : > { %p847_p13 = scmp.ne.s32.totalorder %s1195_s28, %s846_s25  ;;  %s851_s21 = scalar_lea.hbm %s1388_s1, 576 }
  0x49   : > { %p852_p10 = scmp.lt.u32.totalorder %s1195_s28, %s1388_s1  ;;  %p853_p12 = scmp.lt.u32.totalorder %s851_s21, %s846_s25 }
  0x4a   : > { %p849_p3 = pnand %p847_p13, %p818_p11  ;;  %p855_p1 = scmp.lt.u32.totalorder %s846_s25, %s1195_s28 }
  0x4b   : > { %p854_p5 = por %p853_p12, %p852_p10 }
  0x4c   : > { %p850_p4 = pneg %p849_p3 }
  0x4d   : > { %p856_p2 = por %p855_p1, %p854_p5 }
  0x4f   : > { %p857_p7 = pnand %p856_p2, %p850_p4 }
  0x51   : > { %860 = shalt.err (!%p857_p7)
}
  0x52   : > { %s861_s20 = scalar_lea.vmem %s185_s0, 64  ;;  %s1005_s22 = smov [#allocation6]  }
  0x53   : > { %p862_p9 = scmp.ne.s32.totalorder %s185_s0, %s861_s20  ;;  %s866_s23 = sshll.u32 %s1005_s22, 4  ;;  %s867_s23 = int_to_ptr.vmem [resolvable:$false] %s866_s23 }
  0x54   : > { %s868_s26 = scalar_lea.vmem %s867_s23, 128  ;;  %p869_p8 = scmp.lt.s32.totalorder %s185_s0, %s867_s23 }
  0x55   : > { %p864_p13 = pnand %p862_p9, %p818_p11  ;;  %p870_p0 = scmp.lt.s32.totalorder %s868_s26, %s861_s20 }
  0x57   : > { %p865_p3 = pneg %p864_p13  ;;  %p871_p10 = por %p870_p0, %p869_p8 }
  0x59   : > { %p872_p12 = pnand %p871_p10, %p865_p3 }
  0x5b   : > { %875 = shalt.err (!%p872_p12)
}
  0x5c   : > { %702 = dma.hbm_to_vmem [thread:$0]  (!%p1148_p6), %s1195_s28, 64, %s185_s0, %s169_s3  }
  0x5d   : > { %p1406_p4 = scmp.ne.s32.totalorder %s1405_s24, 0 }
  0x5e   : > { %s195_s25 = sand.u32 (!%p1406_p4), 1, %s978_s13   ;;  %p1407_p11 = scmp.ne.s32.totalorder (!%p1406_p4), %s1398_s4, 0 }
  0x5f   : > { %193 = sbr.rel (%p1406_p4) target bundleno = 457 (0x1c9), region = 28  ;;  %s674_s29 = sshll.u32 (!%p1406_p4), %s195_s25, 4 }
  0x60   : > { %s196_s21 = scalar_lea.sflag (!%p1406_p4), [#allocation4], %s195_s25  ;;  %s199_s30 = scalar_lea.vmem (!%p1406_p4), [#allocation3], %s674_s29 }
  0x66   : > { %949 = dma.done.wait (%p1407_p11), %s196_s21, 256  }
  0x67   : > { %951 = vsyncadd (%p1407_p11), %s196_s21, 4294967040  ;;  %s675_s27 = sshll.u32 %s195_s25, 2  ;;  %s205_s20 = scalar_lea.sflag [#allocation7], %s195_s25 }
  0x68   : > { %s1224_s6 = scalar_lea.vmem [#allocation6], %s675_s27 }
  0x69   : > { %953 = dma.done.wait (%p1407_p11), %s205_s20, 64  }
  0x6a   : > { %955 = vsyncadd (%p1407_p11), %s205_s20, 4294967232  ;;  %s231_s0 = sand.u32 1, %s966_s10   ;;  %p677_p8 = scmp.ne.s32.totalorder %s986_s15, 0 }
  0x6b   : > { %s1233_s24 = sshll.u32 %s231_s0, 3  ;;  %v248_v0 = vlaneseq (!%p677_p8)  ;;  %v1006_v1 = vmov (!%p677_p8), 0.0  }
  0x6c   : > { %s233_s28 = scalar_lea.vmem [#allocation8], %s1233_s24  ;;  %247 = sbr.rel (%p677_p8) target bundleno = 115 (0x73), region = 40 }
  0x6d   : > { %vm250_vm0 = vcmp.lt.s32.totalorder (!%p677_p8), %v248_v0, 512 }
  0x6e   : > { %252 = vst.msk [vmem:[#allocation2] sm:$0xf] (!%p677_p8), %vm250_vm0, %v1006_v1 }
  0x73 PF: > { %v253_v2 = vld [vmem:[%s199_s30] sm:$0x77]  ;;  %v254_v3 = vld [vmem:[%s199_s30 + $0x8] sm:$0x77]  ;;  %s399_s4 = smul.u32 5, %s990_s16  ;;  %vm260_vm1 = vcmask 1044480   ;;  %v341_v24 = vlaneseq }
  0x74   : > { %v255_v4 = vunpack.c.l.bf16 %v253_v2  ;;  %v1237_v5 = vunpack.c.h.bf16 %v253_v2  ;;  %v1239_v6 = vunpack.c.l.bf16 %v254_v3  ;;  %v1241_v7 = vunpack.c.h.bf16 %v254_v3  ;;  %v259_v46 = vld [vmem:[%s1224_s6] sm:$0xf] }
  0x75   : > { %s1252_s3 = sadd.s32 %s986_s15, %s399_s4  ;;  %v1255_v33 = vshrl.u32 %v341_v24, 7 }
  0x76   : > { %v261_v8 = vsel %vm260_vm1, %v255_v4, -inf  ;;  %v268_v9 = vsel %vm260_vm1, %v1237_v5, -inf  ;;  %v275_v10 = vsel %vm260_vm1, %v1239_v6, -inf  ;;  %v282_v11 = vsel %vm260_vm1, %v1241_v7, -inf  ;;  %p678_p6 = scmp.ge.s32.totalorder %s1252_s3, 8 }
  0x77   : > { %v262_v12 = vrot.slane %v261_v8, 4  ;;  %v269_v13 = vrot.slane %v268_v9, 4  ;;  %v276_v14 = vrot.slane %v275_v10, 4  ;;  %v283_v15 = vrot.slane %v282_v11, 4 }
  0x78   : > { %v345_v42 = vsub.s32 0, %v1255_v33  ;;  %v349_v48 = vsub.s32 1, %v1255_v33  ;;  %v353_v49 = vsub.s32 2, %v1255_v33  ;;  %v357_v50 = vsub.s32 3, %v1255_v33 }
  0x79   : > { %v263_v16 = vmax.f32 %v261_v8, %v262_v12  ;;  %v270_v17 = vmax.f32 %v268_v9, %v269_v13  ;;  %v277_v18 = vmax.f32 %v275_v10, %v276_v14  ;;  %v284_v19 = vmax.f32 %v282_v11, %v283_v15 }
  0x7a   : > { %v346_v51 = vrot.slane %v259_v46, %v345_v42  ;;  %v350_v52 = vrot.slane %v259_v46, %v349_v48  ;;  %v354_v53 = vrot.slane %v259_v46, %v353_v49  ;;  %v358_v54 = vrot.slane %v259_v46, %v357_v50 }
  0x7b   : > { %v264_v20 = vrot.slane %v263_v16, 2  ;;  %v271_v21 = vrot.slane %v270_v17, 2  ;;  %v278_v22 = vrot.slane %v277_v18, 2  ;;  %v285_v23 = vrot.slane %v284_v19, 2 }
  0x7c   : > { %vm359_vm2 = vcmp.eq.s32.totalorder %v1255_v33, %v346_v51  ;;  %vm360_vm3 = vcmp.eq.s32.totalorder %v1255_v33, %v350_v52  ;;  %vm361_vm4 = vcmp.eq.s32.totalorder %v1255_v33, %v354_v53  ;;  %vm362_vm5 = vcmp.eq.s32.totalorder %v1255_v33, %v358_v54 }
  0x7d   : > { %v265_v25 = vmax.f32 %v263_v16, %v264_v20  ;;  %v272_v26 = vmax.f32 %v270_v17, %v271_v21  ;;  %v279_v27 = vmax.f32 %v277_v18, %v278_v22  ;;  %v286_v28 = vmax.f32 %v284_v19, %v285_v23 }
  0x7e   : > { %v363_v55 = vsel %vm359_vm2, %v255_v4, 0.0  ;;  %v364_v57 = vsel %vm360_vm3, %v1237_v5, 0.0  ;;  %v365_v60 = vsel %vm361_vm4, %v1239_v6, 0.0  ;;  %v366_v0 = vsel %vm362_vm5, %v1241_v7, 0.0 }
  0x7f   : > { %v266_v29 = vrot.slane %v265_v25, 1  ;;  %v273_v30 = vrot.slane %v272_v26, 1  ;;  %v280_v31 = vrot.slane %v279_v27, 1  ;;  %v287_v32 = vrot.slane %v286_v28, 1 }
  0x80   : > { %v367_v1 = vsel %vm260_vm1, %v363_v55, 0.0  ;;  %v374_v8 = vsel %vm260_vm1, %v364_v57, 0.0  ;;  %v388_v14 = vsel %vm260_vm1, %v366_v0, 0.0  ;;  %vm438_vm6 = vcmp.lt.s32.totalorder (!%p678_p6), %v341_v24, 512 }
  0x81   : > { %v1257_v34 = vmax.f32 %v265_v25, %v266_v29  ;;  %v1259_v35 = vmax.f32 %v272_v26, %v273_v30  ;;  %v1261_v36 = vmax.f32 %v279_v27, %v280_v31  ;;  %v1263_v37 = vmax.f32 %v286_v28, %v287_v32 }
  0x82   : > { %v368_v13 = vrot.slane %v367_v1, 4  ;;  %v375_v16 = vrot.slane %v374_v8, 4  ;;  %v389_v22 = vrot.slane %v388_v14, 4 }
  0x83   : > { %v289_v38 = vsub.f32 %v255_v4, %v1257_v34  ;;  %v290_v39 = vsub.f32 %v1237_v5, %v1259_v35  ;;  %v291_v40 = vsub.f32 %v1239_v6, %v1261_v36  ;;  %v292_v41 = vsub.f32 %v1241_v7, %v1263_v37 }
  0x84   : > { %v381_v6 = vsel %vm260_vm1, %v365_v60, 0.0  ;;  %v369_v26 = vadd.f32 %v368_v13, %v367_v1  ;;  %v376_v29 = vadd.f32 %v375_v16, %v374_v8 }
  0x85   : > { %v293_v43 = vmul.f32 1.442695, %v289_v38  ;;  %v295_v44 = vmul.f32 1.442695, %v290_v39  ;;  %v297_v45 = vmul.f32 1.442695, %v291_v40  ;;  %v390_v40 = vadd.f32 %v389_v22, %v388_v14 }
  0x86   : > { %v299_v47 = vmul.f32 1.442695, %v292_v41  ;;  %v382_v19 = vrot.slane %v381_v6, 4  ;;  %v377_v46 = vrot.slane %v376_v29, 2 }
  0x87   : > { %800 = vpow2.f32 %v293_v43  ;;  %v391_v52 = vrot.slane %v390_v40, 2 }
  0x88   : > { %802 = vpow2.f32 %v295_v44  ;;  %v383_v32 = vadd.f32 %v382_v19, %v381_v6  ;;  %v370_v44 = vrot.slane %v369_v26, 2  ;;  %v378_v54 = vadd.f32 %v377_v46, %v376_v29 }
  0x89   : > { %804 = vpow2.f32 %v297_v45 }
  0x8a   : > { %806 = vpow2.f32 %v299_v47  ;;  %v384_v51 = vrot.slane %v383_v32, 2  ;;  %v371_v53 = vadd.f32 %v370_v44, %v369_v26 }
  0x8c   : > { %v385_v55 = vadd.f32 %v384_v51, %v383_v32  ;;  %v372_v57 = vrot.slane %v371_v53, 1 }
  0x8e   : > { %v373_v0 = vadd.f32 %v372_v57, %v371_v53 }
  0x91   : > { %v801_v56 = vpop.eup %800 }
  0x92   : > { %v803_v58 = vpop.eup %802  ;;  %v301_v59 = vsel %vm260_vm1, %v801_v56, 0.0  ;;  %v392_v56 = vadd.f32 %v391_v52, %v390_v40 }
  0x93   : > { %v805_v61 = vpop.eup %804  ;;  %v302_v62 = vrot.slane %v301_v59, 4  ;;  %v308_v63 = vsel %vm260_vm1, %v803_v58, 0.0  ;;  %v379_v58 = vrot.slane %v378_v54, 1 }
  0x94   : > { %v807_v2 = vpop.eup %806  ;;  %v309_v3 = vrot.slane %v308_v63, 4  ;;  %v315_v4 = vsel %vm260_vm1, %v805_v61, 0.0  ;;  %v393_v61 = vrot.slane %v392_v56, 1 }
  0x95   : > { %v303_v5 = vadd.f32 %v302_v62, %v301_v59  ;;  %v316_v9 = vrot.slane %v315_v4, 4  ;;  %v322_v10 = vsel %vm260_vm1, %v807_v2, 0.0  ;;  %v386_v59 = vrot.slane %v385_v55, 1 }
  0x96   : > { %v310_v11 = vadd.f32 %v309_v3, %v308_v63  ;;  %v323_v12 = vrot.slane %v322_v10, 4  ;;  %v380_v3 = vadd.f32 %v379_v58, %v378_v54 }
  0x97   : > { %v304_v7 = vrot.slane %v303_v5, 2  ;;  %v317_v15 = vadd.f32 %v316_v9, %v315_v4  ;;  %v387_v9 = vadd.f32 %v386_v59, %v385_v55 }
  0x98   : > { %v311_v17 = vrot.slane %v310_v11, 2  ;;  %v324_v18 = vadd.f32 %v323_v12, %v322_v10 }
  0x99   : > { %v305_v20 = vadd.f32 %v304_v7, %v303_v5  ;;  %v318_v21 = vrot.slane %v317_v15, 2 }
  0x9a   : > { %v312_v23 = vadd.f32 %v311_v17, %v310_v11  ;;  %v325_v25 = vrot.slane %v324_v18, 2  ;;  %v394_v11 = vadd.f32 %v393_v61, %v392_v56  ;;  %v1007_v17 = vmov (!%p678_p6), 1966171168  }
  0x9b   : > { %v306_v27 = vrot.slane %v305_v20, 1  ;;  %v319_v28 = vadd.f32 %v318_v21, %v317_v15 }
  0x9c   : > { %v313_v30 = vrot.slane %v312_v23, 1  ;;  %v326_v31 = vadd.f32 %v325_v25, %v324_v18  ;;  %v413_v18 = vunpack.c.l.s4 (!%p678_p6), %v1007_v17 }
  0x9d   : > { %v307_v38 = vadd.f32 %v306_v27, %v305_v20  ;;  %v320_v39 = vrot.slane %v319_v28, 1 }
  0x9e   : > { %v314_v41 = vadd.f32 %v313_v30, %v312_v23  ;;  %v327_v43 = vrot.slane %v326_v31, 1  ;;  %v414_v20 = vunpack.c.0.s8 (!%p678_p6), %v413_v18 }
  0x9f   : > { %v321_v45 = vadd.f32 %v320_v39, %v319_v28  ;;  %808 = vlog2.f32 %v307_v38 }
  0xa0   : > { %v328_v47 = vadd.f32 %v327_v43, %v326_v31  ;;  %810 = vlog2.f32 %v314_v41  ;;  %v417_v21 = vsub.s32 (!%p678_p6), %v414_v20, %v1255_v33 }
  0xa1   : > { %812 = vlog2.f32 %v321_v45 }
  0xa2   : > { %814 = vlog2.f32 %v328_v47 }
  0xa9   : > { %v809_v60 = vpop.eup %808 }
  0xaa   : > { %v811_v62 = vpop.eup %810  ;;  %v330_v63 = vmul.f32 0.6931472, %v809_v60 }
  0xab   : > { %v813_v1 = vpop.eup %812  ;;  %v332_v2 = vmul.f32 0.6931472, %v811_v62  ;;  %404 = sbr.rel (%p678_p6) target bundleno = 190 (0xbe), region = 44 }
  0xac   : > { %v815_v4 = vpop.eup %814  ;;  %v334_v8 = vmul.f32 0.6931472, %v813_v1  ;;  %v337_v5 = vadd.f32 %v330_v63, %v1257_v34 }
  0xad   : > { %v336_v10 = vmul.f32 0.6931472, %v815_v4  ;;  %v338_v6 = vadd.f32 %v332_v2, %v1259_v35 }
  0xae   : > { %v339_v12 = vadd.f32 %v334_v8, %v1261_v36  ;;  %v395_v13 = vsub.f32 %v337_v5, %v373_v0  ;;  %v405_v36 = vld [vmem:[#allocation2] sm:$0xf] (!%p678_p6) }
  0xaf   : > { %v340_v14 = vadd.f32 %v336_v10, %v1263_v37  ;;  %v396_v7 = vsub.f32 %v338_v6, %v380_v3 }
  0xb0   : > { %v397_v15 = vsub.f32 %v339_v12, %v387_v9 }
  0xb1   : > { %v398_v16 = vsub.f32 %v340_v14, %v394_v11  ;;  %v410_v19 = vcombine.low (!%p678_p6), %v395_v13, %v396_v7 }
  0xb3   : > { %v411_v34 = vcombine.low %v397_v15, %v398_v16  ;;  %v418_v35 = vrot.slane %v410_v19, %v417_v21 }
  0xb5   : > { %v425_v22 = vrot.slane %v411_v34, %v417_v21 }
  0xb7   : > { %v426_v23 = vcombine.low %v418_v35, %v425_v22 }
  0xb9   : > { %v433_v25 = vrot.slane %v426_v23, %v417_v21 }
  0xbb   : > { %v435_v37 = vadd.f32 %v433_v25, %v405_v36 }
  0xbd   : > { %440 = vst.msk [vmem:[#allocation2] sm:$0xf] %vm438_vm6, %v435_v37 }
  0xbe PF: > { %p679_p0 = scmp.lt.s32.totalorder %s1252_s3, 8 }
  0xbf   : > { %s680_s22 = sshll.u32 (!%p679_p0), %s1252_s3, 9  ;;  %v447_v26 = vand.u32 (!%p679_p0), 127, %v341_v24  ;;  %v1008_v28 = vmov (!%p679_p0), 1966171168   ;;  %vm497_vm11 = vcmp.lt.s32.totalorder (!%p679_p0), %v341_v24, 512 }
  0xc0   : > { %444 = sbr.rel (%p679_p0) target bundleno = 210 (0xd2), region = 48  ;;  %v451_v27 = vstv (!%p679_p0), %s680_s22  ;;  %v472_v29 = vunpack.c.l.s4 (!%p679_p0), %v1008_v28 }
  0xc1   : > { %v448_v30 = vadd.s32 (!%p679_p0), 128, %v447_v26  ;;  %v449_v31 = vadd.s32 (!%p679_p0), 256, %v447_v26  ;;  %v450_v32 = vadd.s32 (!%p679_p0), 384, %v447_v26  ;;  %v452_v38 = vadd.s32 (!%p679_p0), %v451_v27, %v447_v26 }
  0xc2   : > { %v473_v39 = vunpack.c.0.s8 (!%p679_p0), %v472_v29 }
  0xc3   : > { %v453_v40 = vadd.s32 (!%p679_p0), %v451_v27, %v448_v30  ;;  %v454_v41 = vadd.s32 (!%p679_p0), %v451_v27, %v449_v31  ;;  %v455_v43 = vadd.s32 (!%p679_p0), %v451_v27, %v450_v32  ;;  %vm457_vm7 = vcmp.lt.s32.totalorder (!%p679_p0), %v452_v38, 4500 }
  0xc4   : > { %v461_v44 = vsel (!%p679_p0), %vm457_vm7, %v395_v13, 0.0  ;;  %v476_v45 = vsub.s32 (!%p679_p0), %v473_v39, %v1255_v33  ;;  %v456_v57 = vld [vmem:[#allocation2] sm:$0xf] (!%p679_p0) }
  0xc5   : > { %vm458_vm8 = vcmp.lt.s32.totalorder (!%p679_p0), %v453_v40, 4500  ;;  %vm459_vm9 = vcmp.lt.s32.totalorder (!%p679_p0), %v454_v41, 4500  ;;  %vm460_vm10 = vcmp.lt.s32.totalorder (!%p679_p0), %v455_v43, 4500 }
  0xc6   : > { %v462_v46 = vsel (!%p679_p0), %vm458_vm8, %v396_v7, 0.0  ;;  %v463_v47 = vsel (!%p679_p0), %vm459_vm9, %v397_v15, 0.0  ;;  %v464_v51 = vsel (!%p679_p0), %vm460_vm10, %v398_v16, 0.0 }
  0xc7   : > { %v469_v52 = vcombine.low %v461_v44, %v462_v46  ;;  %v470_v53 = vcombine.low %v463_v47, %v464_v51 }
  0xc9   : > { %v477_v54 = vrot.slane %v469_v52, %v476_v45  ;;  %v484_v55 = vrot.slane %v470_v53, %v476_v45 }
  0xcb   : > { %v485_v56 = vcombine.low %v477_v54, %v484_v55 }
  0xcd   : > { %v492_v58 = vrot.slane %v485_v56, %v476_v45 }
  0xcf   : > { %v494_v59 = vadd.f32 %v492_v58, %v456_v57 }
  0xd1   : > { %499 = vst.msk [vmem:[#allocation2] sm:$0xf] %vm497_vm11, %v494_v59 }
  0xd2 PF: > { %p681_p5 = scmp.ne.s32.totalorder %s986_s15, 4 }
  0xd3   : > { %vm526_vm12 = vcmask (!%p681_p5), 1040384  }
  0xd4   : > { %503 = sbr.rel (%p681_p5) target bundleno = 432 (0x1b0), region = 52 }
  0xd8   : > { %v504_v60 = vld [vmem:[#allocation2] sm:$0xf] (!%p681_p5) }
  0xd9   : > { %v509_v61 = vrot.slane (!%p681_p5), %v504_v60, %v345_v42  ;;  %v513_v62 = vrot.slane (!%p681_p5), %v504_v60, %v349_v48  ;;  %v517_v63 = vrot.slane (!%p681_p5), %v504_v60, %v353_v49  ;;  %v521_v24 = vrot.slane (!%p681_p5), %v504_v60, %v357_v50 }
  0xdb   : > { %v527_v0 = vsel %vm526_vm12, %v509_v61, 0.0  ;;  %v528_v1 = vsel %vm526_vm12, %v513_v62, 0.0  ;;  %v530_v2 = vsel %vm526_vm12, %v517_v63, 0.0  ;;  %v532_v4 = vsel %vm526_vm12, %v521_v24, 0.0 }
  0xdc   : > { %v529_v3 = vadd.f32 %v528_v1, %v527_v0 }
  0xde   : > { %v531_v8 = vadd.f32 %v530_v2, %v529_v3 }
  0xe0   : > { %v533_v5 = vadd.f32 %v532_v4, %v531_v8 }
  0xe2   : > { %534 = vadd.xlane.f32.xlu0 %v533_v5 }
 0x16f   : > { %v535_v9 = vpop.xlane.xlu0 %534 }
 0x170   : > { %v536_v42 = vrot.slane %v535_v9, 4 }
 0x172   : > { %v537_v10 = vadd.f32 %v536_v42, %v535_v9 }
 0x174   : > { %v538_v6 = vrot.slane %v537_v10, 2 }
 0x176   : > { %v539_v48 = vadd.f32 %v538_v6, %v537_v10 }
 0x178   : > { %v540_v11 = vrot.slane %v539_v48, 1 }
 0x17a   : > { %v541_v12 = vadd.f32 %v540_v11, %v539_v48 }
 0x17c   : > { %688 = vpush %v541_v12 }
 0x1ad   : > { %s689_s15 = spop %688 }
 0x1ae   : > { %v543_v33 = vstv %s689_s15 }
 0x1af   : > { %544 = vst [vmem:[%s233_s28] sm:$0xff] %v543_v33 }
 0x1b0 PF: > { %s683_s23 = sshll.u32 %s990_s16, 7  ;;  %s559_s21 = sshll.u32 %s233_s28, 4  ;;  %s560_s21 = int_to_ptr.vmem [resolvable:$true] %s559_s21 }
 0x1b1   : > { %s1327_s29 = scalar_lea.hbm %s1389_s2, %s683_s23  ;;  %s546_s30 = scalar_lea.sflag [#allocation5], %s231_s0 }
 0x1b2   : > { %s876_s27 = scalar_lea.vmem %s560_s21, 128  ;;  %p1408_p2 = scmp.ne.s32.totalorder %s1399_s7, 0 }
 0x1b3   : > { %p877_p1 = scmp.ne.s32.totalorder %s560_s21, %s876_s27  ;;  %s1009_s20 = smov [#allocation8]  }
 0x1b4   : > { %s880_s6 = sshll.u32 %s1009_s20, 4  ;;  %s881_s6 = int_to_ptr.vmem [resolvable:$false] %s880_s6 }
 0x1b5   : > { %p878_p7 = pnand %p877_p1, %p1408_p2  ;;  %s882_s4 = scalar_lea.vmem %s881_s6, 256 }
 0x1b6   : > { %p883_p13 = scmp.lt.s32.totalorder %s560_s21, %s881_s6  ;;  %p884_p3 = scmp.lt.s32.totalorder %s882_s4, %s876_s27 }
 0x1b7   : > { %p879_p9 = pneg %p878_p7 }
 0x1b8   : > { %p885_p10 = por %p884_p3, %p883_p13 }
 0x1ba   : > { %p886_p12 = pnand %p885_p10, %p879_p9 }
 0x1bc   : > { %889 = shalt.err (!%p886_p12)
}
 0x1bd   : > { %s890_s16 = scalar_lea.hbm %s1327_s29, 128  ;;  %s894_s28 = scalar_lea.hbm %s1389_s2, 256 }
 0x1be   : > { %p891_p4 = scmp.ne.s32.totalorder %s1327_s29, %s890_s16  ;;  %p895_p6 = scmp.lt.u32.totalorder %s1327_s29, %s1389_s2 }
 0x1bf   : > { %p896_p0 = scmp.lt.u32.totalorder %s894_s28, %s890_s16  ;;  %p898_p1 = scmp.lt.u32.totalorder %s890_s16, %s1327_s29 }
 0x1c0   : > { %p892_p11 = pnand %p891_p4, %p1408_p2 }
 0x1c1   : > { %p897_p5 = por %p896_p0, %p895_p6 }
 0x1c2   : > { %p893_p8 = pneg %p892_p11 }
 0x1c3   : > { %p899_p7 = por %p898_p1, %p897_p5 }
 0x1c5   : > { %p900_p9 = pnand %p899_p7, %p893_p8 }
 0x1c7   : > { %903 = shalt.err (!%p900_p9)
}
 0x1c8   : > { %694 = dma.vmem_to_hbm [thread:$0]  (%p1408_p2), %s560_s21, 128, %s1327_s29, %s546_s30  }
 0x1c9 PF: > { %p708_p13 = scmp.ge.s32.totalorder %s1002_s19, 2  ;;  %s571_s15 = sand.u32 1, %s962_s9  }
 0x1ca   : > { %p1409_p3 = scmp.ne.s32.totalorder %s1400_s12, 0  ;;  %s572_s23 = scalar_lea.sflag [#allocation5], %s571_s15 }
 0x1cc   : > { %p704_p10 = pnand %p708_p13, %p1409_p3 }
 0x1ce   : > { %957 = dma.done.wait (!%p704_p10), %s572_s23, 128  }
 0x1cf   : > { %959 = vsyncadd (!%p704_p10), %s572_s23, 4294967168  ;;  %s21_s19 = sadd.s32 1, %s1002_s19   ;;  %s1410_s7 = sld [smem:[#allocation12_spill]] }
 0x1d0   : > { %p18_p12 = scmp.ge.s32.totalorder %s21_s19, 12   ;;  %s1411_s26 = sld [smem:[#allocation13_spill]] }
 0x1d1   : > { %s1412_s9 = smov %s966_s10  ;;  %s1413_s10 = smov %s970_s11 }
 0x1d2   : > { %s1414_s11 = smov %s1115_s5  ;;  %s1415_s12 = smov %s978_s13 }
 0x1d3   : > { %s1416_s13 = smov %s982_s14  ;;  %s1417_s14 = smov %s1129_s8 }
 0x1d4   : > { %s1418_s15 = smov %s994_s17  ;;  %s1419_s16 = smov %s998_s18 }
 0x1d5   : > { %s1420_s17 = smov %s1410_s7  ;;  %20 = sbr.rel (!%p18_p12) target bundleno = 13 (0xd), region = 102 }
 0x1d6   : > { %s1421_s18 = smov %s1411_s26 }
 0x1dc   :  { %577 = vsyncpa [#allocation4], 1 }
 0x1dd   :  { %579 = vsyncpa [#allocation4 + $0x1], 1 }
 0x1de   :  { %580 = vsyncpa [#allocation7], 1 }
 0x1df   :  { %582 = vsyncpa [#allocation7 + $0x1], 1 }
 0x1e0   :  { %583 = vsyncpa [#allocation5], 1 }
 0x1e1   :  { %585 = vsyncpa [#allocation5 + $0x1], 1 }

</bundles_post_ra>
